<compile_context>
chip_gen: v5e
topology: v5e:2x2
jax: 0.10.0
libtpu: 0.0.40
codegen_flags: <defaults>
</compile_context>

<pallas_src>
import jax
import jax.numpy as jnp
from jax.experimental import pallas as pl
from jax.experimental.pallas import tpu as pltpu

LANE = 128                                    # every feature / class dim padded to this
VMEM_SPEC = pl.BlockSpec(memory_space=pltpu.MemorySpace.VMEM)


def _sigmoid(x):
    # Exact sigmoid (EUP exp + real divide).  approx reciprocal was removed so
    # outputs / atom weights stay in [0, 1] and match the fp32 reference.
    return 1.0 / (1.0 + jnp.exp(-x))


# ---------------------------------------------------------------------------
# Fused kernel: all GIN layers + WeightAndSum readout + fc1/mlp/fc2
# ---------------------------------------------------------------------------
def _make_fused_kernel(n_gcn, n_dense):
    """n_gcn GIN layers, n_dense = fc1 + mlp linears, then fc2.

    Slab layout:
      w_ref : (n_mm, 128, 128) bf16   matmul weights (BN folded), n_mm = n_gcn+n_dense+1
      e_ref : (n_mm + 1, 128)  f32    rows 0..n_mm-1 = folded biases, row n_mm = atom bias
      wa_ref: (128, 1)         f32    atom_weighting weight column
    """
    idx_ba = n_gcn + n_dense + 1                  # row of the replicated atom-weighting bias

    def kernel(a_ref, m_ref, h_ref, w_ref, e_ref, wa_ref, out_ref, aw_ref):
        a = a_ref[...]                            # (N, N) bf16 adjacency
        h = h_ref[...].astype(jnp.float32)        # (N, F_pad) activations, f32 between layers

        li = 0
        # --- GIN layers: relu(A @ (h W') + h W' + b')  (BN folded, dropout = id)
        for _ in range(n_gcn):
            w = w_ref[li]                         # (F_pad, F_pad) bf16
            b = e_ref[li:li + 1, :]               # (1, F_pad) f32
            hw = jnp.dot(h.astype(jnp.bfloat16), w, preferred_element_type=jnp.float32)
            y = jnp.dot(a, hw.astype(jnp.bfloat16),
                        preferred_element_type=jnp.float32) + hw + b
            h = jnp.maximum(y, 0.0)
            li += 1

        # --- WeightAndSum readout (lane-dense node weights) -------------------
        # aw[n] = <h[n, :], wa> + ba, computed with the node index on the LANE
        # axis: VPU multiply + sublane reduce (no 1-column MXU matmul, no (N,1)
        # masked stores for the atom-weight output).
        wa = wa_ref[...]                          # (F_pad, 1) f32
        ba = e_ref[idx_ba:idx_ba + 1, 0:1]        # (1, 1)     f32
        aw_row = jnp.sum(h.T * wa, axis=0, keepdims=True) + ba      # (1, N)
        aw_ref[...] = aw_row                      # raw (pre-sigmoid) atom weights
        w_row = _sigmoid(aw_row)                  # (1, N) node weights
        # pooled x[g] = sum_n M[g,n] * w[n] * h[n,:]  ==  (M .* w_row) @ h
        mw = (m_ref[...].astype(jnp.float32) * w_row).astype(jnp.bfloat16)
        x = jnp.dot(mw, h.astype(jnp.bfloat16), preferred_element_type=jnp.float32)

        # --- fc1 + mlp stack: Linear + folded BN + ReLU -------------------------
        for _ in range(n_dense):
            w = w_ref[li]
            b = e_ref[li:li + 1, :]
            x = jnp.maximum(
                jnp.dot(x.astype(jnp.bfloat16), w,
                        preferred_element_type=jnp.float32) + b, 0.0)
            li += 1

        # --- fc2 + exact sigmoid -------------------------------------------------
        w = w_ref[li]
        b = e_ref[li:li + 1, :]
        y = jnp.dot(x.astype(jnp.bfloat16), w, preferred_element_type=jnp.float32) + b
        out_ref[...] = _sigmoid(y)

    return kernel


# ---------------------------------------------------------------------------
# Wrapper (single pallas_call; everything resident in VMEM at these sizes)
# ---------------------------------------------------------------------------
def classifier_forward(a, m, h0, w_slab, e_slab, wa_col, *,
                       n_gcn, n_dense, n_graphs, n_nodes, n_classes):
    g_pad, n_pad = m.shape
    kernel = _make_fused_kernel(n_gcn, n_dense)
    out_pad, aw_row = pl.pallas_call(
        kernel,
        out_shape=(jax.ShapeDtypeStruct((g_pad, LANE), jnp.float32),   # padded classes
                   jax.ShapeDtypeStruct((1, n_pad), jnp.float32)),     # lane-dense atom w
        in_specs=[VMEM_SPEC] * 6,
        out_specs=(VMEM_SPEC, VMEM_SPEC),
        compiler_params=pltpu.CompilerParams(
            vmem_limit_bytes=48 * 1024 * 1024),    # explicit; under v7x 64 MiB physical
    )(a, m, h0, w_slab, e_slab, wa_col)
    out = out_pad[:n_graphs, :n_classes]                               # host-side slice
    atom_w = aw_row[0, :n_nodes].reshape(n_nodes, 1)                   # host-side reshape
    return out, atom_w


# ---------------------------------------------------------------------------
# Parameter construction (deterministic, synthetic; BN folded + slab-packed)
# ---------------------------------------------------------------------------
def _pad2(x, rows, cols):
    out = jnp.zeros((rows, cols), x.dtype)
    return out.at[:x.shape[0], :x.shape[1]].set(x)


def _linear_params(key, in_f, out_f):
    kw, kb = jax.random.split(key)
    w = jax.random.normal(kw, (in_f, out_f), jnp.float32) * 0.1        # (in, out)
    b = jax.random.normal(kb, (1, out_f), jnp.float32) * 0.1
    return w, b


def _bn_scale_shift(key, f, eps=1e-5):
    kg, kb, km, kv = jax.random.split(key, 4)
    gamma = 1.0 + 0.1 * jax.random.normal(kg, (1, f), jnp.float32)
    beta = 0.1 * jax.random.normal(kb, (1, f), jnp.float32)
    run_mean = 0.1 * jax.random.normal(km, (1, f), jnp.float32)
    run_var = 1.0 + 0.1 * jax.random.uniform(kv, (1, f), jnp.float32)
    scale = gamma / jnp.sqrt(run_var + eps)
    shift = beta - run_mean * scale
    return scale, shift


def _fold(w, b, scale, shift):
    # Linear followed by eval-mode BN -> single Linear.
    return w * scale, b * scale + shift


def init_params(key, in_feats, graph_hidden, depth, mlp_layers, out_classes=67):
    keys = jax.random.split(key, 64)
    ki = iter(keys)
    mm_layers = []      # (w (in,out) f32, b (1,out) f32) for every MXU layer, BN folded

    # gcn1 (+ gcn1_bn)
    w, b = _linear_params(next(ki), in_feats, graph_hidden)
    s, sh = _bn_scale_shift(next(ki), graph_hidden)
    mm_layers.append(_fold(w, b, s, sh))

    # gcn2 / gcn2_bn stack
    for _ in range(depth - 1):
        w, b = _linear_params(next(ki), graph_hidden, graph_hidden)
        s, sh = _bn_scale_shift(next(ki), graph_hidden)
        mm_layers.append(_fold(w, b, s, sh))

    # atom_weighting Linear(H, 1) -- kept on the VPU path, not in the matmul slab
    wa, ba = _linear_params(next(ki), graph_hidden, 1)

    # fc1 (+ bn1)
    w, b = _linear_params(next(ki), graph_hidden, mlp_layers[0])
    s, sh = _bn_scale_shift(next(ki), mlp_layers[0])
    mm_layers.append(_fold(w, b, s, sh))

    # mlp stack (+ bns)
    for i in range(len(mlp_layers) - 1):
        w, b = _linear_params(next(ki), mlp_layers[i], mlp_layers[i + 1])
        s, sh = _bn_scale_shift(next(ki), mlp_layers[i + 1])
        mm_layers.append(_fold(w, b, s, sh))

    # fc2 (no BN); classes zero-padded to LANE, sliced back on the host.
    w, b = _linear_params(next(ki), mlp_layers[-1], out_classes)
    mm_layers.append((w, b))

    # ---- pack into two lane-aligned slabs (2 big DMAs instead of 12+ tiny ones)
    w_slab = jnp.stack([_pad2(w, LANE, LANE) for w, _ in mm_layers]).astype(jnp.bfloat16)
    e_rows = [_pad2(b, 1, LANE)[0] for _, b in mm_layers]
    e_rows.append(jnp.full((LANE,), ba[0, 0], jnp.float32))            # replicated atom bias
    e_slab = jnp.stack(e_rows).astype(jnp.float32)                     # (n_mm + 1, LANE)
    wa_col = _pad2(wa, LANE, 1).astype(jnp.float32)                    # (LANE, 1)
    return w_slab, e_slab, wa_col


# ---------------------------------------------------------------------------
# Example
# ---------------------------------------------------------------------------
if __name__ == "__main__":
    key = jax.random.PRNGKey(0)
    k_graph, k_feat, k_param = jax.random.split(key, 3)

    in_feats = 38
    graph_hidden = 32
    depth = 2
    mlp_layers = [32, 16]
    out_classes = 67
    num_graphs, nodes_per_graph = 4, 32        # N = 128: fills a full lane tile per matmul
    n_nodes = num_graphs * nodes_per_graph
    g_pad = max(8, num_graphs)

    # Block-diagonal undirected adjacency (no self loops), built & kept in bf16
    # (0/1 exact) -- no f32->bf16 round trip of the O(N^2) array at call time.
    adj = jnp.zeros((n_nodes, n_nodes), jnp.float32)
    gkeys = jax.random.split(k_graph, num_graphs)
    for gi in range(num_graphs):
        blk = (jax.random.uniform(gkeys[gi], (nodes_per_graph, nodes_per_graph)) < 0.3)
        blk = jnp.triu(blk, 1)
        blk = (blk | blk.T).astype(jnp.float32)
        s = gi * nodes_per_graph
        adj = adj.at[s:s + nodes_per_graph, s:s + nodes_per_graph].set(blk)
    adj = adj.astype(jnp.bfloat16)

    # Graph-membership one-hot (G_pad, N), bf16 (padded graph rows are zero).
    member = jnp.zeros((g_pad, n_nodes), jnp.float32)
    for gi in range(num_graphs):
        s = gi * nodes_per_graph
        member = member.at[gi, s:s + nodes_per_graph].set(1.0)
    member = member.astype(jnp.bfloat16)

    # Node features, zero-padded on the feature axis to LANE, passed in bf16.
    feats = jax.random.normal(k_feat, (n_nodes, in_feats), jnp.float32)
    feats = _pad2(feats, n_nodes, LANE).astype(jnp.bfloat16)

    w_slab, e_slab, wa_col = init_params(k_param, in_feats, graph_hidden, depth,
                                         mlp_layers, out_classes)

    n_dense = 1 + (len(mlp_layers) - 1)        # fc1 + mlp linears
    out, atom_w = classifier_forward(adj, member, feats, w_slab, e_slab, wa_col,
                                     n_gcn=depth, n_dense=n_dense,
                                     n_graphs=num_graphs, n_nodes=n_nodes,
                                     n_classes=out_classes)
    out = jax.block_until_ready(out)
    atom_w = jax.block_until_ready(atom_w)

    assert out.shape == (num_graphs, out_classes)
    assert atom_w.shape == (n_nodes, 1)
    assert bool(jnp.all(jnp.isfinite(out))) and bool(jnp.all(jnp.isfinite(atom_w)))
    assert bool(jnp.all(out >= 0.0)) and bool(jnp.all(out <= 1.0))
    print("KERNEL_OK")
</pallas_src>

<mosaic_0001>
module attributes {stable_mosaic.version = 11 : i64} {
  func.func @kernel(%arg0: memref<128x128xbf16, #tpu.memory_space<vmem>>, %arg1: memref<8x128xbf16, #tpu.memory_space<vmem>>, %arg2: memref<128x128xbf16, #tpu.memory_space<vmem>>, %arg3: memref<5x128x128xbf16, #tpu.memory_space<vmem>>, %arg4: memref<6x128xf32, #tpu.memory_space<vmem>>, %arg5: memref<128x1xf32, #tpu.memory_space<vmem>>, %arg6: memref<8x128xf32, #tpu.memory_space<vmem>>, %arg7: memref<1x128xf32, #tpu.memory_space<vmem>>) attributes {dimension_semantics = [], scalar_prefetch = 0 : i64, scratch_operands = 0 : i64, tpu.core_type = #tpu.core_type<tc>} {
    %c0 = arith.constant 0 : index
    %c0_0 = arith.constant 0 : index
    %0 = vector.load %arg0[%c0, %c0_0] : memref<128x128xbf16, #tpu.memory_space<vmem>>, vector<128x128xbf16>
    %c0_1 = arith.constant 0 : index
    %c0_2 = arith.constant 0 : index
    %1 = vector.load %arg2[%c0_1, %c0_2] : memref<128x128xbf16, #tpu.memory_space<vmem>>, vector<128x128xbf16>
    %2 = arith.extf %1 : vector<128x128xbf16> to vector<128x128xf32>
    %c0_3 = arith.constant 0 : index
    %c0_4 = arith.constant 0 : index
    %c0_5 = arith.constant 0 : index
    %3 = vector.load %arg3[%c0_3, %c0_4, %c0_5] : memref<5x128x128xbf16, #tpu.memory_space<vmem>>, vector<1x128x128xbf16>
    %4 = vector.shape_cast %3 : vector<1x128x128xbf16> to vector<128x128xbf16>
    %c0_6 = arith.constant 0 : index
    %c0_7 = arith.constant 0 : index
    %5 = vector.load %arg4[%c0_6, %c0_7] : memref<6x128xf32, #tpu.memory_space<vmem>>, vector<1x128xf32>
    %6 = arith.truncf %2 : vector<128x128xf32> to vector<128x128xbf16>
    %cst = arith.constant dense<0.000000e+00> : vector<128x128xf32>
    %7 = tpu.matmul %6, %4, %cst {dimension_numbers = #tpu.dot_dimension_numbers<[1], [0], [0], [1], [0, 0, 1, 1], [], []>} : vector<128x128xbf16>, vector<128x128xbf16>, vector<128x128xf32> -> vector<128x128xf32>
    %8 = arith.truncf %7 : vector<128x128xf32> to vector<128x128xbf16>
    %cst_8 = arith.constant dense<0.000000e+00> : vector<128x128xf32>
    %9 = tpu.matmul %0, %8, %cst_8 {dimension_numbers = #tpu.dot_dimension_numbers<[1], [0], [0], [1], [0, 0, 1, 1], [], []>} : vector<128x128xbf16>, vector<128x128xbf16>, vector<128x128xf32> -> vector<128x128xf32>
    %10 = arith.addf %9, %7 : vector<128x128xf32>
    %11 = vector.broadcast %5 : vector<1x128xf32> to vector<128x128xf32>
    %12 = arith.addf %10, %11 : vector<128x128xf32>
    %cst_9 = arith.constant 0.000000e+00 : f32
    %13 = vector.broadcast %cst_9 : f32 to vector<128x128xf32>
    %14 = arith.maximumf %12, %13 : vector<128x128xf32>
    %c1 = arith.constant 1 : index
    %c0_10 = arith.constant 0 : index
    %c0_11 = arith.constant 0 : index
    %15 = vector.load %arg3[%c1, %c0_10, %c0_11] : memref<5x128x128xbf16, #tpu.memory_space<vmem>>, vector<1x128x128xbf16>
    %16 = vector.shape_cast %15 : vector<1x128x128xbf16> to vector<128x128xbf16>
    %c1_12 = arith.constant 1 : index
    %c0_13 = arith.constant 0 : index
    %17 = vector.load %arg4[%c1_12, %c0_13] : memref<6x128xf32, #tpu.memory_space<vmem>>, vector<1x128xf32>
    %18 = arith.truncf %14 : vector<128x128xf32> to vector<128x128xbf16>
    %cst_14 = arith.constant dense<0.000000e+00> : vector<128x128xf32>
    %19 = tpu.matmul %18, %16, %cst_14 {dimension_numbers = #tpu.dot_dimension_numbers<[1], [0], [0], [1], [0, 0, 1, 1], [], []>} : vector<128x128xbf16>, vector<128x128xbf16>, vector<128x128xf32> -> vector<128x128xf32>
    %20 = arith.truncf %19 : vector<128x128xf32> to vector<128x128xbf16>
    %cst_15 = arith.constant dense<0.000000e+00> : vector<128x128xf32>
    %21 = tpu.matmul %0, %20, %cst_15 {dimension_numbers = #tpu.dot_dimension_numbers<[1], [0], [0], [1], [0, 0, 1, 1], [], []>} : vector<128x128xbf16>, vector<128x128xbf16>, vector<128x128xf32> -> vector<128x128xf32>
    %22 = arith.addf %21, %19 : vector<128x128xf32>
    %23 = vector.broadcast %17 : vector<1x128xf32> to vector<128x128xf32>
    %24 = arith.addf %22, %23 : vector<128x128xf32>
    %cst_16 = arith.constant 0.000000e+00 : f32
    %25 = vector.broadcast %cst_16 : f32 to vector<128x128xf32>
    %26 = arith.maximumf %24, %25 : vector<128x128xf32>
    %c0_17 = arith.constant 0 : index
    %c0_18 = arith.constant 0 : index
    %27 = vector.load %arg5[%c0_17, %c0_18] : memref<128x1xf32, #tpu.memory_space<vmem>>, vector<128x1xf32>
    %c5 = arith.constant 5 : index
    %c0_19 = arith.constant 0 : index
    %28 = vector.load %arg4[%c5, %c0_19] : memref<6x128xf32, #tpu.memory_space<vmem>>, vector<1x1xf32>
    %29 = tpu.transpose %26, [1, 0] : vector<128x128xf32> -> vector<128x128xf32>
    %30 = vector.broadcast %27 : vector<128x1xf32> to vector<128x128xf32>
    %31 = arith.mulf %29, %30 : vector<128x128xf32>
    %cst_20 = arith.constant dense<0.000000e+00> : vector<128xf32>
    %32 = vector.multi_reduction <add>, %31, %cst_20 [0] : vector<128x128xf32> to vector<128xf32>
    %33 = vector.shape_cast %32 : vector<128xf32> to vector<1x128xf32>
    %34 = vector.broadcast %28 : vector<1x1xf32> to vector<1x128xf32>
    %35 = arith.addf %33, %34 : vector<1x128xf32>
    %c0_21 = arith.constant 0 : index
    %c0_22 = arith.constant 0 : index
    %36 = vector.load %arg7[%c0_21, %c0_22] : memref<1x128xf32, #tpu.memory_space<vmem>>, vector<1x128xf32>
    tpu.vector_store %arg7[%c0_21, %c0_22], %35 {strides = array<i32>} : memref<1x128xf32, #tpu.memory_space<vmem>>, vector<1x128xf32>,
    %cst_23 = arith.constant 0.000000e+00 : f32
    %37 = vector.broadcast %cst_23 : f32 to vector<1x128xf32>
    %38 = arith.subf %37, %35 : vector<1x128xf32>
    %39 = math.exp %38 : vector<1x128xf32>
    %cst_24 = arith.constant 1.000000e+00 : f32
    %40 = vector.broadcast %cst_24 : f32 to vector<1x128xf32>
    %41 = arith.addf %40, %39 : vector<1x128xf32>
    %cst_25 = arith.constant 1.000000e+00 : f32
    %42 = vector.broadcast %cst_25 : f32 to vector<1x128xf32>
    %43 = arith.divf %42, %41 : vector<1x128xf32>
    %c0_26 = arith.constant 0 : index
    %c0_27 = arith.constant 0 : index
    %44 = vector.load %arg1[%c0_26, %c0_27] : memref<8x128xbf16, #tpu.memory_space<vmem>>, vector<8x128xbf16>
    %45 = arith.extf %44 : vector<8x128xbf16> to vector<8x128xf32>
    %46 = vector.broadcast %43 : vector<1x128xf32> to vector<8x128xf32>
    %47 = arith.mulf %45, %46 : vector<8x128xf32>
    %48 = arith.truncf %47 : vector<8x128xf32> to vector<8x128xbf16>
    %49 = arith.truncf %26 : vector<128x128xf32> to vector<128x128xbf16>
    %cst_28 = arith.constant dense<0.000000e+00> : vector<8x128xf32>
    %50 = tpu.matmul %48, %49, %cst_28 {dimension_numbers = #tpu.dot_dimension_numbers<[1], [0], [0], [1], [0, 0, 1, 1], [], []>} : vector<8x128xbf16>, vector<128x128xbf16>, vector<8x128xf32> -> vector<8x128xf32>
    %c2 = arith.constant 2 : index
    %c0_29 = arith.constant 0 : index
    %c0_30 = arith.constant 0 : index
    %51 = vector.load %arg3[%c2, %c0_29, %c0_30] : memref<5x128x128xbf16, #tpu.memory_space<vmem>>, vector<1x128x128xbf16>
    %52 = vector.shape_cast %51 : vector<1x128x128xbf16> to vector<128x128xbf16>
    %c2_31 = arith.constant 2 : index
    %c0_32 = arith.constant 0 : index
    %53 = vector.load %arg4[%c2_31, %c0_32] : memref<6x128xf32, #tpu.memory_space<vmem>>, vector<1x128xf32>
    %54 = arith.truncf %50 : vector<8x128xf32> to vector<8x128xbf16>
    %cst_33 = arith.constant dense<0.000000e+00> : vector<8x128xf32>
    %55 = tpu.matmul %54, %52, %cst_33 {dimension_numbers = #tpu.dot_dimension_numbers<[1], [0], [0], [1], [0, 0, 1, 1], [], []>} : vector<8x128xbf16>, vector<128x128xbf16>, vector<8x128xf32> -> vector<8x128xf32>
    %56 = vector.broadcast %53 : vector<1x128xf32> to vector<8x128xf32>
    %57 = arith.addf %55, %56 : vector<8x128xf32>
    %cst_34 = arith.constant 0.000000e+00 : f32
    %58 = vector.broadcast %cst_34 : f32 to vector<8x128xf32>
    %59 = arith.maximumf %57, %58 : vector<8x128xf32>
    %c3 = arith.constant 3 : index
    %c0_35 = arith.constant 0 : index
    %c0_36 = arith.constant 0 : index
    %60 = vector.load %arg3[%c3, %c0_35, %c0_36] : memref<5x128x128xbf16, #tpu.memory_space<vmem>>, vector<1x128x128xbf16>
    %61 = vector.shape_cast %60 : vector<1x128x128xbf16> to vector<128x128xbf16>
    %c3_37 = arith.constant 3 : index
    %c0_38 = arith.constant 0 : index
    %62 = vector.load %arg4[%c3_37, %c0_38] : memref<6x128xf32, #tpu.memory_space<vmem>>, vector<1x128xf32>
    %63 = arith.truncf %59 : vector<8x128xf32> to vector<8x128xbf16>
    %cst_39 = arith.constant dense<0.000000e+00> : vector<8x128xf32>
    %64 = tpu.matmul %63, %61, %cst_39 {dimension_numbers = #tpu.dot_dimension_numbers<[1], [0], [0], [1], [0, 0, 1, 1], [], []>} : vector<8x128xbf16>, vector<128x128xbf16>, vector<8x128xf32> -> vector<8x128xf32>
    %65 = vector.broadcast %62 : vector<1x128xf32> to vector<8x128xf32>
    %66 = arith.addf %64, %65 : vector<8x128xf32>
    %cst_40 = arith.constant 0.000000e+00 : f32
    %67 = vector.broadcast %cst_40 : f32 to vector<8x128xf32>
    %68 = arith.maximumf %66, %67 : vector<8x128xf32>
    %c4 = arith.constant 4 : index
    %c0_41 = arith.constant 0 : index
    %c0_42 = arith.constant 0 : index
    %69 = vector.load %arg3[%c4, %c0_41, %c0_42] : memref<5x128x128xbf16, #tpu.memory_space<vmem>>, vector<1x128x128xbf16>
    %70 = vector.shape_cast %69 : vector<1x128x128xbf16> to vector<128x128xbf16>
    %c4_43 = arith.constant 4 : index
    %c0_44 = arith.constant 0 : index
    %71 = vector.load %arg4[%c4_43, %c0_44] : memref<6x128xf32, #tpu.memory_space<vmem>>, vector<1x128xf32>
    %72 = arith.truncf %68 : vector<8x128xf32> to vector<8x128xbf16>
    %cst_45 = arith.constant dense<0.000000e+00> : vector<8x128xf32>
    %73 = tpu.matmul %72, %70, %cst_45 {dimension_numbers = #tpu.dot_dimension_numbers<[1], [0], [0], [1], [0, 0, 1, 1], [], []>} : vector<8x128xbf16>, vector<128x128xbf16>, vector<8x128xf32> -> vector<8x128xf32>
    %74 = vector.broadcast %71 : vector<1x128xf32> to vector<8x128xf32>
    %75 = arith.addf %73, %74 : vector<8x128xf32>
    %cst_46 = arith.constant 0.000000e+00 : f32
    %76 = vector.broadcast %cst_46 : f32 to vector<8x128xf32>
    %77 = arith.subf %76, %75 : vector<8x128xf32>
    %78 = math.exp %77 : vector<8x128xf32>
    %cst_47 = arith.constant 1.000000e+00 : f32
    %79 = vector.broadcast %cst_47 : f32 to vector<8x128xf32>
    %80 = arith.addf %79, %78 : vector<8x128xf32>
    %cst_48 = arith.constant 1.000000e+00 : f32
    %81 = vector.broadcast %cst_48 : f32 to vector<8x128xf32>
    %82 = arith.divf %81, %80 : vector<8x128xf32>
    %c0_49 = arith.constant 0 : index
    %c0_50 = arith.constant 0 : index
    %83 = vector.load %arg6[%c0_49, %c0_50] : memref<8x128xf32, #tpu.memory_space<vmem>>, vector<8x128xf32>
    tpu.vector_store %arg6[%c0_49, %c0_50], %82 {strides = array<i32>} : memref<8x128xf32, #tpu.memory_space<vmem>>, vector<8x128xf32>,
    return
  }
}

</mosaic_0001>

<bundles_post_ra>
// kernel: tpu_custom_call.1
= control target key start
LH: loop header
LB: loop body
LE: loop exit
PB: predicated region body
PF: predicated region fallthrough
CT: control target
= control target key end

     0   :  { %13 = vsyncpa [#allocation3], 0  ;;  %s1915_s0 = inlined_call_operand.vmem [shape: bf16[128,128], index: 0, kind: input, shape index: {}]   ;;  %s1916_s1 = inlined_call_operand.hbm [shape: bf16[8,128], index: 1, kind: input, shape index: {}]   ;;  %s1917_s2 = inlined_call_operand.vmem [shape: bf16[128,128], index: 2, kind: input, shape index: {}]   ;;  %s1918_s3 = inlined_call_operand.hbm [shape: bf16[5,128,128], index: 3, kind: input, shape index: {}]   ;;  %s1919_s4 = inlined_call_operand.hbm [shape: f32[6,128], index: 4, kind: input, shape index: {}]   ;;  %s1920_s5 = inlined_call_operand.vmem [shape: f32[128,1], index: 5, kind: input, shape index: {}]   ;;  %s1921_s6 = inlined_call_operand.hbm [shape: f32[8,128], index: 6, kind: output, shape index: {0}]   ;;  %s1922_s7 = inlined_call_operand.hbm [shape: f32[1,128], index: 7, kind: output, shape index: {1}]  }
   0x1   :  { %14 = vsyncpa [#allocation6], 0 }
   0x2   :  { %15 = vsyncpa [#allocation4], 0  ;;  %s36_s26 = sshll.u32 %s1918_s3, 4  ;;  %s37_s26 = int_to_ptr.hbm [resolvable:$true] %s36_s26 }
   0x3   :  { %16 = vsyncpa [#allocation10], 0  ;;  %s1563_s27 = smov [#allocation5]   ;;  %s24_s8 = sshll.u32 %s1916_s1, 4  ;;  %s25_s8 = int_to_ptr.hbm [resolvable:$true] %s24_s8 }
   0x4   :  { %s38_s28 = sshll.u32 %s1563_s27, 4  ;;  %s1564_s9 = smov 64   ;;  %s39_s28 = int_to_ptr.vmem [resolvable:$true] %s38_s28 }
   0x5   :  { %s1565_s10 = smov 4   ;;  %s1566_s11 = smov [#allocation2]  }
   0x6   :  { %44 = dma.hbm_to_vmem [thread:$0]  %s37_s26, 5120, %s39_s28, [#allocation6], %s1564_s9, %s1564_s9, %s1565_s10  }
   0x7   :  { %s26_s12 = sshll.u32 %s1566_s11, 4  ;;  %s50_s15 = sshll.u32 %s1919_s4, 4  ;;  %s27_s12 = int_to_ptr.vmem [resolvable:$true] %s26_s12  ;;  %s51_s15 = int_to_ptr.hbm [resolvable:$true] %s50_s15 }
   0x8   :  { %29 = dma.hbm_to_vmem [thread:$0]  %s25_s8, 64, %s27_s12, [#allocation3]  }
   0x9   :  { %s1567_s3 = smov [#allocation7]  }
   0xa   :  { %s52_s16 = sshll.u32 %s1567_s3, 4  ;;  %s53_s16 = int_to_ptr.vmem [resolvable:$true] %s52_s16 }
   0xb   :  { %55 = dma.hbm_to_vmem [thread:$0]  %s51_s15, 128, %s53_s16, [#allocation6]  }
   0xc   :  { %1555 = dma.done.wait [#allocation3], 64  }
   0xd   :  { %1556 = vsyncadd [#allocation3], 4294967232 }
   0xe   :  { %1557 = dma.done.wait [#allocation6], 5248  }
   0xf   :  { %1558 = vsyncadd [#allocation6], 4294962048  ;;  %v1379_v0 = vld [vmem:[#allocation5 + $0x38] sm:$0xff]  ;;  %v1378_v1 = vld [vmem:[#allocation5 + $0x30] sm:$0xff]  ;;  %s1116_s26 = sshll.u32 %s1922_s7, 4  ;;  %s1570_s7 = smov [#allocation8]   ;;  %s1117_s26 = int_to_ptr.hbm [resolvable:$true] %s1116_s26 }
  0x10   :  { %215 = vmatpush.bf16.msra.mxu0 %v1379_v0  ;;  %v1377_v2 = vld [vmem:[#allocation5 + $0x28] sm:$0xff]  ;;  %v1376_v3 = vld [vmem:[#allocation5 + $0x20] sm:$0xff]  ;;  %v1375_v4 = vld [vmem:[#allocation5 + $0x18] sm:$0xff]  ;;  %s1103_s27 = sshll.u32 %s1570_s7, 4  ;;  %s1105_s30 = sshll.u32 %s1921_s6, 4  ;;  %s1104_s27 = int_to_ptr.vmem [resolvable:$true] %s1103_s27  ;;  %s1106_s30 = int_to_ptr.hbm [resolvable:$true] %s1105_s30 }
  0x11   :  { %v1374_v5 = vld [vmem:[#allocation5 + $0x10] sm:$0xff]  ;;  %v1373_v6 = vld [vmem:[#allocation5 + $0x8] sm:$0xff]  ;;  %v1372_v7 = vld [vmem:[#allocation5] sm:$0xff] }
  0x12   :  { %v1364_v8 = vld [vmem:[%s1917_s2] sm:$0xff]  ;;  %v1365_v9 = vld [vmem:[%s1917_s2 + $0x8] sm:$0xff]  ;;  %v1366_v10 = vld [vmem:[%s1917_s2 + $0x10] sm:$0xff] }
  0x13   :  { %v1367_v11 = vld [vmem:[%s1917_s2 + $0x18] sm:$0xff]  ;;  %v1368_v12 = vld [vmem:[%s1917_s2 + $0x20] sm:$0xff]  ;;  %v1369_v13 = vld [vmem:[%s1917_s2 + $0x28] sm:$0xff] }
  0x14   :  { %216 = vmatpush.bf16.msra.mxu0 %v1378_v1  ;;  %v1370_v14 = vld [vmem:[%s1917_s2 + $0x30] sm:$0xff]  ;;  %v1371_v15 = vld [vmem:[%s1917_s2 + $0x38] sm:$0xff]  ;;  %v1695_v40 = vld [vmem:[%s1915_s0] sm:$0xff] }
  0x15   :  { %v1701_v41 = vld [vmem:[%s1915_s0 + $0x8] sm:$0xff]  ;;  %v1707_v42 = vld [vmem:[%s1915_s0 + $0x10] sm:$0xff]  ;;  %v1713_v43 = vld [vmem:[%s1915_s0 + $0x18] sm:$0xff] }
  0x16   :  { %v1719_v44 = vld [vmem:[%s1915_s0 + $0x20] sm:$0xff]  ;;  %v1725_v46 = vld [vmem:[%s1915_s0 + $0x28] sm:$0xff]  ;;  %v1386_v47 = vld [vmem:[#allocation5 + $0x70] sm:$0xff] }
  0x17   :  { %v1387_v45 = vld [vmem:[#allocation5 + $0x78] sm:$0xff]  ;;  %v1385_v48 = vld [vmem:[#allocation5 + $0x68] sm:$0xff]  ;;  %v1384_v49 = vld [vmem:[#allocation5 + $0x60] sm:$0xff] }
  0x18   :  { %217 = vmatpush.bf16.msra.mxu0 %v1377_v2  ;;  %476 = vmatpush.bf16.msra.mxu2 %v1387_v45  ;;  %v1731_v50 = vld [vmem:[%s1915_s0 + $0x30] sm:$0xff]  ;;  %v1383_v51 = vld [vmem:[#allocation5 + $0x58] sm:$0xff]  ;;  %v1380_v54 = vld [vmem:[#allocation5 + $0x40] sm:$0xff] }
  0x19   :  { %v1382_v52 = vld [vmem:[#allocation5 + $0x50] sm:$0xff]  ;;  %v1381_v53 = vld [vmem:[#allocation5 + $0x48] sm:$0xff]  ;;  %v1741_v58 = vld [vmem:[#allocation7] ss:$0 sm:$0xff] }
  0x1a   :  { %v1737_v55 = vld [vmem:[%s1915_s0 + $0x38] sm:$0xff] }
  0x1c   :  { %218 = vmatpush.bf16.msra.mxu0 %v1376_v3  ;;  %477 = vmatpush.bf16.msra.mxu2 %v1386_v47 }
  0x20   :  { %219 = vmatpush.bf16.msra.mxu0 %v1375_v4  ;;  %478 = vmatpush.bf16.msra.mxu2 %v1385_v48 }
  0x24   :  { %220 = vmatpush.bf16.msra.mxu0 %v1374_v5  ;;  %479 = vmatpush.bf16.msra.mxu2 %v1384_v49 }
  0x28   :  { %221 = vmatpush.bf16.msra.mxu0 %v1373_v6  ;;  %480 = vmatpush.bf16.msra.mxu2 %v1383_v51 }
  0x2c   :  { %222 = vmatpush.bf16.msra.mxu0 %v1372_v7  ;;  %481 = vmatpush.bf16.msra.mxu2 %v1382_v52 }
  0x2f   :  { %223 = vmatmul.bf16.vlgmr.msra.gmra.mxu0 %v1364_v8 }
  0x30   :  { %482 = vmatpush.bf16.msra.mxu2 %v1381_v53 }
  0x34   :  { %483 = vmatpush.bf16.msra.mxu2 %v1380_v54 }
  0x3f   :  { %228 = vmatmul.bf16.gmra.mxu0 %v1365_v9 }
  0x4f   :  { %233 = vmatmul.bf16.gmra.mxu0 %v1366_v10 }
  0x5f   :  { %238 = vmatmul.bf16.gmra.mxu0 %v1367_v11 }
  0x6f   :  { %243 = vmatmul.bf16.gmra.mxu0 %v1368_v12 }
  0x7f   :  { %248 = vmatmul.bf16.gmra.mxu0 %v1369_v13 }
  0x8f   :  { %253 = vmatmul.bf16.gmra.mxu0 %v1370_v14 }
  0x9f   :  { %258 = vmatmul.bf16.gmra.mxu0 %v1371_v15 }
  0xac   :  { %v1644_v16 = vpop.f32.mrf.mxu0 }
  0xb4   :  { %v1646_v17 = vpop.f32.mrf.mxu0 }
  0xb5   :  { %v264_v39 = vpack.c.bf16 %v1646_v17, %v1644_v16 }
  0xbc   :  { %v1648_v18 = vpop.f32.mrf.mxu0 }
  0xc4   :  { %v1650_v19 = vpop.f32.mrf.mxu0 }
  0xc5   :  { %v265_v38 = vpack.c.bf16 %v1650_v19, %v1648_v18 }
  0xcc   :  { %v1652_v20 = vpop.f32.mrf.mxu0 }
  0xd4   :  { %v1654_v21 = vpop.f32.mrf.mxu0 }
  0xd5   :  { %v266_v37 = vpack.c.bf16 %v1654_v21, %v1652_v20 }
  0xdc   :  { %v1656_v22 = vpop.f32.mrf.mxu0 }
  0xe4   :  { %v1658_v23 = vpop.f32.mrf.mxu0 }
  0xe5   :  { %v267_v36 = vpack.c.bf16 %v1658_v23, %v1656_v22 }
  0xec   :  { %v1660_v24 = vpop.f32.mrf.mxu0 }
  0xf4   :  { %v1662_v25 = vpop.f32.mrf.mxu0 }
  0xf5   :  { %v268_v35 = vpack.c.bf16 %v1662_v25, %v1660_v24 }
  0xfc   :  { %v1664_v26 = vpop.f32.mrf.mxu0 }
 0x104   :  { %v1666_v27 = vpop.f32.mrf.mxu0 }
 0x105   :  { %v269_v34 = vpack.c.bf16 %v1666_v27, %v1664_v26 }
 0x10c   :  { %v1668_v28 = vpop.f32.mrf.mxu0 }
 0x114   :  { %v1670_v29 = vpop.f32.mrf.mxu0 }
 0x115   :  { %v270_v33 = vpack.c.bf16 %v1670_v29, %v1668_v28 }
 0x11c   :  { %v1672_v30 = vpop.f32.mrf.mxu0 }
 0x124   :  { %v1674_v31 = vpop.f32.mrf.mxu0 }
 0x125   :  { %v271_v32 = vpack.c.bf16 %v1674_v31, %v1672_v30 }
 0x127   :  { %320 = vmatpush.bf16.msra.mxu1 %v271_v32 }
 0x12b   :  { %321 = vmatpush.bf16.msra.mxu1 %v270_v33 }
 0x12f   :  { %322 = vmatpush.bf16.msra.mxu1 %v269_v34 }
 0x133   :  { %323 = vmatpush.bf16.msra.mxu1 %v268_v35 }
 0x137   :  { %324 = vmatpush.bf16.msra.mxu1 %v267_v36 }
 0x13b   :  { %325 = vmatpush.bf16.msra.mxu1 %v266_v37 }
 0x13f   :  { %326 = vmatpush.bf16.msra.mxu1 %v265_v38 }
 0x143   :  { %327 = vmatpush.bf16.msra.mxu1 %v264_v39 }
 0x146   :  { %328 = vmatmul.bf16.vlgmr.msra.gmra.mxu1 %v1695_v40 }
 0x156   :  { %333 = vmatmul.bf16.gmra.mxu1 %v1701_v41 }
 0x166   :  { %338 = vmatmul.bf16.gmra.mxu1 %v1707_v42 }
 0x176   :  { %343 = vmatmul.bf16.gmra.mxu1 %v1713_v43 }
 0x186   :  { %348 = vmatmul.bf16.gmra.mxu1 %v1719_v44 }
 0x196   :  { %353 = vmatmul.bf16.gmra.mxu1 %v1725_v46 }
 0x1a6   :  { %358 = vmatmul.bf16.gmra.mxu1 %v1731_v50 }
 0x1b6   :  { %363 = vmatmul.bf16.gmra.mxu1 %v1737_v55 }
 0x1c3   :  { %v329_v56 = vpop.f32.mrf.mxu1 }
 0x1c4   :  { %v330_v57 = vadd.f32 %v329_v56, %v1644_v16 }
 0x1c6   :  { %v370_v60 = vadd.f32 %v1741_v58, %v330_v57 }
 0x1c8   :  { %v386_v63 = vmax.f32 %v370_v60, 0.0 }
 0x1cb   :  { %v331_v59 = vpop.f32.mrf.mxu1 }
 0x1cc   :  { %v332_v61 = vadd.f32 %v331_v59, %v1646_v17 }
 0x1ce   :  { %v371_v62 = vadd.f32 %v1741_v58, %v332_v61 }
 0x1d0   :  { %v387_v0 = vmax.f32 %v371_v62, 0.0 }
 0x1d2   :  { %v420_v1 = vpack.c.bf16 %v387_v0, %v386_v63 }
 0x1d3   :  { %v334_v2 = vpop.f32.mrf.mxu1 }
 0x1d4   :  { %484 = vmatmul.bf16.vlgmr.msra.gmra.mxu2 %v420_v1  ;;  %v335_v3 = vadd.f32 %v334_v2, %v1648_v18 }
 0x1d6   :  { %v372_v5 = vadd.f32 %v1741_v58, %v335_v3 }
 0x1d8   :  { %v388_v8 = vmax.f32 %v372_v5, 0.0 }
 0x1db   :  { %v336_v4 = vpop.f32.mrf.mxu1 }
 0x1dc   :  { %v337_v6 = vadd.f32 %v336_v4, %v1650_v19 }
 0x1de   :  { %v373_v7 = vadd.f32 %v1741_v58, %v337_v6 }
 0x1e0   :  { %v389_v9 = vmax.f32 %v373_v7, 0.0 }
 0x1e2   :  { %v421_v10 = vpack.c.bf16 %v389_v9, %v388_v8 }
 0x1e3   :  { %v339_v11 = vpop.f32.mrf.mxu1 }
 0x1e4   :  { %489 = vmatmul.bf16.gmra.mxu2 %v421_v10  ;;  %v340_v12 = vadd.f32 %v339_v11, %v1652_v20 }
 0x1e6   :  { %v374_v14 = vadd.f32 %v1741_v58, %v340_v12 }
 0x1e8   :  { %v390_v17 = vmax.f32 %v374_v14, 0.0 }
 0x1eb   :  { %v341_v13 = vpop.f32.mrf.mxu1 }
 0x1ec   :  { %v342_v15 = vadd.f32 %v341_v13, %v1654_v21 }
 0x1ee   :  { %v375_v16 = vadd.f32 %v1741_v58, %v342_v15 }
 0x1f0   :  { %v391_v18 = vmax.f32 %v375_v16, 0.0 }
 0x1f2   :  { %v422_v32 = vpack.c.bf16 %v391_v18, %v390_v17 }
 0x1f3   :  { %v344_v19 = vpop.f32.mrf.mxu1 }
 0x1f4   :  { %494 = vmatmul.bf16.gmra.mxu2 %v422_v32  ;;  %v345_v33 = vadd.f32 %v344_v19, %v1656_v22 }
 0x1f6   :  { %v376_v35 = vadd.f32 %v1741_v58, %v345_v33 }
 0x1f8   :  { %v392_v37 = vmax.f32 %v376_v35, 0.0 }
 0x1fb   :  { %v346_v34 = vpop.f32.mrf.mxu1 }
 0x1fc   :  { %v347_v36 = vadd.f32 %v346_v34, %v1658_v23 }
 0x1fe   :  { %v377_v20 = vadd.f32 %v1741_v58, %v347_v36 }
 0x200   :  { %v393_v38 = vmax.f32 %v377_v20, 0.0 }
 0x202   :  { %v423_v39 = vpack.c.bf16 %v393_v38, %v392_v37 }
 0x203   :  { %v349_v21 = vpop.f32.mrf.mxu1 }
 0x204   :  { %499 = vmatmul.bf16.gmra.mxu2 %v423_v39  ;;  %v350_v45 = vadd.f32 %v349_v21, %v1660_v24 }
 0x206   :  { %v378_v48 = vadd.f32 %v1741_v58, %v350_v45 }
 0x208   :  { %v394_v51 = vmax.f32 %v378_v48, 0.0 }
 0x20b   :  { %v351_v47 = vpop.f32.mrf.mxu1 }
 0x20c   :  { %v352_v49 = vadd.f32 %v351_v47, %v1662_v25 }
 0x20e   :  { %v379_v22 = vadd.f32 %v1741_v58, %v352_v49  ;;  %v1821_v49 = vld [vmem:[#allocation7 + $0x1] ss:$0 sm:$0xff] }
 0x210   :  { %v395_v52 = vmax.f32 %v379_v22, 0.0 }
 0x212   :  { %v424_v53 = vpack.c.bf16 %v395_v52, %v394_v51 }
 0x213   :  { %v354_v23 = vpop.f32.mrf.mxu1 }
 0x214   :  { %504 = vmatmul.bf16.gmra.mxu2 %v424_v53  ;;  %v355_v54 = vadd.f32 %v354_v23, %v1664_v26 }
 0x216   :  { %v380_v57 = vadd.f32 %v1741_v58, %v355_v54  ;;  %v616_v54 = vld [vmem:[%s1920_s5 + $0x8] sm:$0xff] }
 0x218   :  { %v396_v60 = vmax.f32 %v380_v57, 0.0 }
 0x21b   :  { %v356_v56 = vpop.f32.mrf.mxu1 }
 0x21c   :  { %v357_v59 = vadd.f32 %v356_v56, %v1666_v27  ;;  %v617_v56 = vld [vmem:[%s1920_s5 + $0x10] sm:$0xff] }
 0x21e   :  { %v381_v24 = vadd.f32 %v1741_v58, %v357_v59 }
 0x220   :  { %v397_v61 = vmax.f32 %v381_v24, 0.0 }
 0x222   :  { %v425_v62 = vpack.c.bf16 %v397_v61, %v396_v60  ;;  %v619_v61 = vld [vmem:[%s1920_s5 + $0x20] sm:$0xff] }
 0x223   :  { %v359_v25 = vpop.f32.mrf.mxu1 }
 0x224   :  { %509 = vmatmul.bf16.gmra.mxu2 %v425_v62  ;;  %v360_v63 = vadd.f32 %v359_v25, %v1668_v28  ;;  %v618_v62 = vld [vmem:[%s1920_s5 + $0x18] sm:$0xff] }
 0x226   :  { %v382_v1 = vadd.f32 %v1741_v58, %v360_v63 }
 0x228   :  { %v398_v3 = vmax.f32 %v382_v1, 0.0 }
 0x22b   :  { %v361_v0 = vpop.f32.mrf.mxu1 }
 0x22c   :  { %v362_v2 = vadd.f32 %v361_v0, %v1670_v29 }
 0x22e   :  { %v383_v26 = vadd.f32 %v1741_v58, %v362_v2 }
 0x230   :  { %v399_v4 = vmax.f32 %v383_v26, 0.0  ;;  %v621_v26 = vld [vmem:[%s1920_s5 + $0x30] sm:$0xff] }
 0x232   :  { %v426_v5 = vpack.c.bf16 %v399_v4, %v398_v3  ;;  %v620_v3 = vld [vmem:[%s1920_s5 + $0x28] sm:$0xff] }
 0x233   :  { %v364_v27 = vpop.f32.mrf.mxu1 }
 0x234   :  { %514 = vmatmul.bf16.gmra.mxu2 %v426_v5  ;;  %v365_v6 = vadd.f32 %v364_v27, %v1672_v30 }
 0x236   :  { %v384_v8 = vadd.f32 %v1741_v58, %v365_v6 }
 0x238   :  { %v400_v10 = vmax.f32 %v384_v8, 0.0  ;;  %v622_v8 = vld [vmem:[%s1920_s5 + $0x38] sm:$0xff] }
 0x23b   :  { %v366_v7 = vpop.f32.mrf.mxu1 }
 0x23c   :  { %v367_v9 = vadd.f32 %v366_v7, %v1674_v31  ;;  %v623_v7 = vld [vmem:[%s1920_s5 + $0x40] sm:$0xff] }
 0x23e   :  { %v385_v28 = vadd.f32 %v1741_v58, %v367_v9 }
 0x240   :  { %v401_v11 = vmax.f32 %v385_v28, 0.0 }
 0x242   :  { %v427_v12 = vpack.c.bf16 %v401_v11, %v400_v10 }
 0x244   :  { %519 = vmatmul.bf16.gmra.mxu2 %v427_v12 }
 0x257   :  { %v485_v29 = vpop.f32.mrf.mxu2 }
 0x25f   :  { %v487_v13 = vpop.f32.mrf.mxu2 }
 0x260   :  { %v525_v48 = vpack.c.bf16 %v487_v13, %v485_v29 }
 0x267   :  { %v490_v14 = vpop.f32.mrf.mxu2 }
 0x26f   :  { %v1774_v15 = vpop.f32.mrf.mxu2 }
 0x270   :  { %v526_v47 = vpack.c.bf16 %v1774_v15, %v490_v14 }
 0x277   :  { %v1776_v16 = vpop.f32.mrf.mxu2 }
 0x27f   :  { %v1778_v17 = vpop.f32.mrf.mxu2 }
 0x280   :  { %v527_v45 = vpack.c.bf16 %v1778_v17, %v1776_v16 }
 0x287   :  { %v1780_v30 = vpop.f32.mrf.mxu2 }
 0x28f   :  { %v1782_v18 = vpop.f32.mrf.mxu2 }
 0x290   :  { %v528_v21 = vpack.c.bf16 %v1782_v18, %v1780_v30 }
 0x297   :  { %v1784_v31 = vpop.f32.mrf.mxu2 }
 0x29f   :  { %v1786_v58 = vpop.f32.mrf.mxu2 }
 0x2a0   :  { %v529_v39 = vpack.c.bf16 %v1786_v58, %v1784_v31 }
 0x2a7   :  { %v1788_v32 = vpop.f32.mrf.mxu2 }
 0x2af   :  { %v1790_v19 = vpop.f32.mrf.mxu2 }
 0x2b0   :  { %v530_v38 = vpack.c.bf16 %v1790_v19, %v1788_v32 }
 0x2b7   :  { %v1792_v33 = vpop.f32.mrf.mxu2 }
 0x2bf   :  { %v1794_v34 = vpop.f32.mrf.mxu2 }
 0x2c0   :  { %v531_v37 = vpack.c.bf16 %v1794_v34, %v1792_v33 }
 0x2c7   :  { %v1796_v35 = vpop.f32.mrf.mxu2 }
 0x2cf   :  { %v1798_v36 = vpop.f32.mrf.mxu2 }
 0x2d0   :  { %v532_v20 = vpack.c.bf16 %v1798_v36, %v1796_v35 }
 0x2d2   :  { %533 = vmatpush.bf16.msra.mxu3 %v532_v20  ;;  %v626_v20 = vld [vmem:[%s1920_s5 + $0x58] sm:$0xff] }
 0x2d6   :  { %534 = vmatpush.bf16.msra.mxu3 %v531_v37 }
 0x2da   :  { %535 = vmatpush.bf16.msra.mxu3 %v530_v38 }
 0x2de   :  { %536 = vmatpush.bf16.msra.mxu3 %v529_v39 }
 0x2e2   :  { %537 = vmatpush.bf16.msra.mxu3 %v528_v21 }
 0x2e6   :  { %538 = vmatpush.bf16.msra.mxu3 %v527_v45 }
 0x2ea   :  { %539 = vmatpush.bf16.msra.mxu3 %v526_v47  ;;  %v628_v47 = vld [vmem:[%s1920_s5 + $0x68] sm:$0xff] }
 0x2ee   :  { %540 = vmatpush.bf16.msra.mxu3 %v525_v48 }
 0x2f1   :  { %541 = vmatmul.bf16.vlgmr.msra.gmra.mxu3 %v1695_v40 }
 0x301   :  { %546 = vmatmul.bf16.gmra.mxu3 %v1701_v41 }
 0x311   :  { %551 = vmatmul.bf16.gmra.mxu3 %v1707_v42 }
 0x321   :  { %556 = vmatmul.bf16.gmra.mxu3 %v1713_v43  ;;  %v615_v43 = vld [vmem:[%s1920_s5] sm:$0xff] }
 0x331   :  { %561 = vmatmul.bf16.gmra.mxu3 %v1719_v44  ;;  %v1568_v44 = vmov 0  }
 0x332   :  { %1420 = vset.pattern.permute.xlu0 %v1568_v44  ;;  %1421 = vset.pattern.permute.xlu1 %v1568_v44 }
 0x333   :  { %666 = vperm.xlu0 %1420, %v615_v43   ;;  %676 = vperm.xlu1 %1421, %v617_v56  }
 0x33b   :  { %671 = vperm.xlu0 %1420, %v616_v54   ;;  %681 = vperm.xlu1 %1421, %v618_v62  }
 0x341   :  { %566 = vmatmul.bf16.gmra.mxu3 %v1725_v46 }
 0x343   :  { %686 = vperm.xlu0 %1420, %v619_v61   ;;  %691 = vperm.xlu1 %1421, %v620_v3  }
 0x34b   :  { %696 = vperm.xlu0 %1420, %v621_v26   ;;  %701 = vperm.xlu1 %1421, %v622_v8  }
 0x351   :  { %571 = vmatmul.bf16.gmra.mxu3 %v1731_v50 }
 0x353   :  { %706 = vperm.xlu0 %1420, %v623_v7  }
 0x361   :  { %576 = vmatmul.bf16.gmra.mxu3 %v1737_v55 }
 0x374   :  { %v542_v22 = vpop.f32.mrf.mxu3 }
 0x375   :  { %v543_v51 = vadd.f32 %v542_v22, %v485_v29  ;;  %v625_v29 = vld [vmem:[%s1920_s5 + $0x50] sm:$0xff] }
 0x376   :  { %716 = vperm.xlu0 %1420, %v625_v29  }
 0x377   :  { %v583_v40 = vadd.f32 %v1821_v49, %v543_v51 }
 0x379   :  { %v599_v52 = vmax.f32 %v583_v40, 0.0 }
 0x37b   :  { %632 = vxpose.xlu2.b32.start [1/16] %v599_v52, 128 }
 0x37c   :  { %v544_v41 = vpop.f32.mrf.mxu3 }
 0x37d   :  { %v545_v42 = vadd.f32 %v544_v41, %v487_v13  ;;  %v624_v13 = vld [vmem:[%s1920_s5 + $0x48] sm:$0xff] }
 0x37e   :  { %711 = vperm.xlu1 %1421, %v624_v13  }
 0x37f   :  { %v584_v46 = vadd.f32 %v1821_v49, %v545_v42 }
 0x381   :  { %v600_v50 = vmax.f32 %v584_v46, 0.0 }
 0x383   :  { %633 = vxpose.xlu2.b32.cont [2/16] %v600_v50, 128  ;;  %v1828_v55 = vpack.c.bf16 %v600_v50, %v599_v52  ;;  %v631_v52 = vld [vmem:[#allocation7 + $0x5] sm:$0x1] }
 0x384   :  { %v547_v53 = vpop.f32.mrf.mxu3 }
 0x385   :  { %v548_v23 = vadd.f32 %v547_v53, %v490_v14 }
 0x386   :  { %721 = vperm.xlu1 %1421, %v626_v20  }
 0x387   :  { %v585_v57 = vadd.f32 %v1821_v49, %v548_v23 }
 0x389   :  { %v601_v59 = vmax.f32 %v585_v57, 0.0 }
 0x38b   :  { %634 = vxpose.xlu2.b32.cont [3/16] %v601_v59, 128 }
 0x38c   :  { %v549_v24 = vpop.f32.mrf.mxu3 }
 0x38d   :  { %v550_v60 = vadd.f32 %v549_v24, %v1774_v15 }
 0x38e   :  { %731 = vperm.xlu1 %1421, %v628_v47  }
 0x38f   :  { %v586_v25 = vadd.f32 %v1821_v49, %v550_v60 }
 0x391   :  { %v602_v63 = vmax.f32 %v586_v25, 0.0 }
 0x393   :  { %635 = vxpose.xlu2.b32.cont [4/16] %v602_v63, 128  ;;  %v1845_v0 = vpack.c.bf16 %v602_v63, %v601_v59 }
 0x394   :  { %v552_v1 = vpop.f32.mrf.mxu3 }
 0x395   :  { %v553_v2 = vadd.f32 %v552_v1, %v1776_v16 }
 0x397   :  { %v587_v4 = vadd.f32 %v1821_v49, %v553_v2 }
 0x399   :  { %v603_v5 = vmax.f32 %v587_v4, 0.0 }
 0x39b   :  { %636 = vxpose.xlu2.b32.cont [5/16] %v603_v5, 128 }
 0x39c   :  { %v554_v27 = vpop.f32.mrf.mxu3 }
 0x39d   :  { %v555_v6 = vadd.f32 %v554_v27, %v1778_v17 }
 0x39f   :  { %v588_v9 = vadd.f32 %v1821_v49, %v555_v6 }
 0x3a1   :  { %v604_v28 = vmax.f32 %v588_v9, 0.0 }
 0x3a3   :  { %637 = vxpose.xlu2.b32.cont [6/16] %v604_v28, 128  ;;  %v1863_v10 = vpack.c.bf16 %v604_v28, %v603_v5 }
 0x3a4   :  { %v557_v11 = vpop.f32.mrf.mxu3 }
 0x3a5   :  { %v558_v12 = vadd.f32 %v557_v11, %v1780_v30  ;;  %v627_v30 = vld [vmem:[%s1920_s5 + $0x60] sm:$0xff]  ;;  %v677_v28 = vpop.permute.xlu1 %676 }
 0x3a6   :  { %726 = vperm.xlu0 %1420, %v627_v30  }
 0x3a7   :  { %v589_v14 = vadd.f32 %v1821_v49, %v558_v12 }
 0x3a9   :  { %v605_v15 = vmax.f32 %v589_v14, 0.0 }
 0x3ab   :  { %638 = vxpose.xlu2.b32.cont [7/16] %v605_v15, 128 }
 0x3ac   :  { %v559_v16 = vpop.f32.mrf.mxu3 }
 0x3ad   :  { %v560_v17 = vadd.f32 %v559_v16, %v1782_v18  ;;  %v629_v18 = vld [vmem:[%s1920_s5 + $0x70] sm:$0xff]  ;;  %v682_v13 = vpop.permute.xlu1 %681 }
 0x3ae   :  { %736 = vperm.xlu0 %1420, %v629_v18  }
 0x3af   :  { %v590_v37 = vadd.f32 %v1821_v49, %v560_v17 }
 0x3b1   :  { %v606_v38 = vmax.f32 %v590_v37, 0.0 }
 0x3b3   :  { %639 = vxpose.xlu2.b32.cont [8/16] %v606_v38, 128  ;;  %v815_v39 = vpack.c.bf16 %v606_v38, %v605_v15 }
 0x3b4   :  { %v562_v21 = vpop.f32.mrf.mxu3 }
 0x3b5   :  { %v563_v45 = vadd.f32 %v562_v21, %v1784_v31  ;;  %v630_v31 = vld [vmem:[%s1920_s5 + $0x78] sm:$0xff]  ;;  %s1569_s5 = smov [#allocation9]  }
 0x3b6   :  { %741 = vperm.xlu1 %1421, %v630_v31   ;;  %783 = vperm.xlu0 %1420, %v631_v52   ;;  %s1114_s23 = sshll.u32 %s1569_s5, 4  ;;  %s1115_s23 = int_to_ptr.vmem [resolvable:$true] %s1114_s23 }
 0x3b7   :  { %v591_v48 = vadd.f32 %v1821_v49, %v563_v45 }
 0x3b9   :  { %v607_v22 = vmax.f32 %v591_v48, 0.0 }
 0x3bb   :  { %640 = vxpose.xlu2.b32.cont [9/16] %v607_v22, 128 }
 0x3bc   :  { %v564_v51 = vpop.f32.mrf.mxu3 }
 0x3bd   :  { %v565_v40 = vadd.f32 %v564_v51, %v1786_v58 }
 0x3bf   :  { %v592_v41 = vadd.f32 %v1821_v49, %v565_v40 }
 0x3c1   :  { %v608_v42 = vmax.f32 %v592_v41, 0.0 }
 0x3c3   :  { %641 = vxpose.xlu2.b32.cont [10/16] %v608_v42, 128  ;;  %v816_v27 = vpack.c.bf16 %v608_v42, %v607_v22 }
 0x3c4   :  { %v567_v43 = vpop.f32.mrf.mxu3 }
 0x3c5   :  { %v568_v44 = vadd.f32 %v567_v43, %v1788_v32 }
 0x3c7   :  { %v593_v46 = vadd.f32 %v1821_v49, %v568_v44 }
 0x3c9   :  { %v609_v50 = vmax.f32 %v593_v46, 0.0 }
 0x3cb   :  { %642 = vxpose.xlu2.b32.cont [11/16] %v609_v50, 128 }
 0x3cc   :  { %v569_v53 = vpop.f32.mrf.mxu3 }
 0x3cd   :  { %v570_v58 = vadd.f32 %v569_v53, %v1790_v19 }
 0x3cf   :  { %v594_v23 = vadd.f32 %v1821_v49, %v570_v58 }
 0x3d1   :  { %v610_v54 = vmax.f32 %v594_v23, 0.0 }
 0x3d3   :  { %643 = vxpose.xlu2.b32.cont [12/16] %v610_v54, 128  ;;  %v817_v5 = vpack.c.bf16 %v610_v54, %v609_v50 }
 0x3d4   :  { %v572_v56 = vpop.f32.mrf.mxu3 }
 0x3d5   :  { %v573_v57 = vadd.f32 %v572_v56, %v1792_v33 }
 0x3d7   :  { %v595_v59 = vadd.f32 %v1821_v49, %v573_v57 }
 0x3d9   :  { %v611_v24 = vmax.f32 %v595_v59, 0.0 }
 0x3db   :  { %644 = vxpose.xlu2.b32.cont [13/16] %v611_v24, 128 }
 0x3dc   :  { %v574_v60 = vpop.f32.mrf.mxu3 }
 0x3dd   :  { %v575_v32 = vadd.f32 %v574_v60, %v1794_v34 }
 0x3df   :  { %v596_v61 = vadd.f32 %v1821_v49, %v575_v32 }
 0x3e1   :  { %v612_v62 = vmax.f32 %v596_v61, 0.0 }
 0x3e3   :  { %645 = vxpose.xlu2.b32.cont [14/16] %v612_v62, 128  ;;  %v818_v34 = vpack.c.bf16 %v612_v62, %v611_v24 }
 0x3e4   :  { %v577_v25 = vpop.f32.mrf.mxu3 }
 0x3e5   :  { %v578_v19 = vadd.f32 %v577_v25, %v1796_v35  ;;  %v667_v35 = vpop.permute.xlu0 %666 }
 0x3e7   :  { %v597_v63 = vadd.f32 %v1821_v49, %v578_v19 }
 0x3e9   :  { %v613_v1 = vmax.f32 %v597_v63, 0.0 }
 0x3eb   :  { %646 = vxpose.xlu2.b32.cont [15/16] %v613_v1, 128 }
 0x3ec   :  { %v579_v2 = vpop.f32.mrf.mxu3 }
 0x3ed   :  { %v580_v33 = vadd.f32 %v579_v2, %v1798_v36 }
 0x3ef   :  { %v598_v26 = vadd.f32 %v1821_v49, %v580_v33  ;;  %v672_v49 = vpop.permute.xlu0 %671 }
 0x3f1   :  { %v614_v3 = vmax.f32 %v598_v26, 0.0 }
 0x3f3   :  { %647 = vxpose.xlu2.b32.end [16/16] %v614_v3, 128  ;;  %v819_v4 = vpack.c.bf16 %v614_v3, %v613_v1 }
 0x3f5   :  { %820 = vmatpush.bf16.msrb.mxu0 %v819_v4 }
 0x3f9   :  { %821 = vmatpush.bf16.msrb.mxu0 %v818_v34 }
 0x3fd   :  { %822 = vmatpush.bf16.msrb.mxu0 %v817_v5 }
 0x401   :  { %823 = vmatpush.bf16.msrb.mxu0 %v816_v27 }
 0x405   :  { %824 = vmatpush.bf16.msrb.mxu0 %v815_v39  ;;  %v692_v39 = vpop.permute.xlu1 %691 }
 0x409   :  { %825 = vmatpush.bf16.msrb.mxu0 %v1863_v10  ;;  %v687_v10 = vpop.permute.xlu0 %686 }
 0x40d   :  { %826 = vmatpush.bf16.msrb.mxu0 %v1845_v0  ;;  %v702_v18 = vpop.permute.xlu1 %701 }
 0x411   :  { %827 = vmatpush.bf16.msrb.mxu0 %v1828_v55  ;;  %v697_v45 = vpop.permute.xlu0 %696 }
 0x414   :  { %v648_v36 = vpop.trf.xlu2 }
 0x415   :  { %v744_v7 = vmul.f32 %v667_v35, %v648_v36  ;;  %v712_v51 = vpop.permute.xlu1 %711 }
 0x419   :  { %v707_v48 = vpop.permute.xlu0 %706 }
 0x41c   :  { %v649_v6 = vpop.trf.xlu2 }
 0x41d   :  { %v745_v8 = vmul.f32 %v672_v49, %v649_v6  ;;  %v722_v41 = vpop.permute.xlu1 %721 }
 0x41f   :  { %v760_v9 = vadd.f32 %v745_v8, %v744_v7 }
 0x421   :  { %v717_v40 = vpop.permute.xlu0 %716 }
 0x424   :  { %v650_v11 = vpop.trf.xlu2 }
 0x425   :  { %v746_v12 = vmul.f32 %v677_v28, %v650_v11  ;;  %v732_v59 = vpop.permute.xlu1 %731 }
 0x427   :  { %v761_v29 = vadd.f32 %v760_v9, %v746_v12  ;;  %v1395_v12 = vld [vmem:[#allocation5 + $0xb8] sm:$0xff] }
 0x428   :  { %901 = vmatpush.bf16.msrb.mxu1 %v1395_v12 }
 0x429   :  { %v727_v58 = vpop.permute.xlu0 %726 }
 0x42c   :  { %v651_v14 = vpop.trf.xlu2 }
 0x42d   :  { %v747_v15 = vmul.f32 %v682_v13, %v651_v14  ;;  %v742_v26 = vpop.permute.xlu1 %741  ;;  %v1393_v14 = vld [vmem:[#allocation5 + $0xa8] sm:$0xff] }
 0x42f   :  { %v762_v16 = vadd.f32 %v761_v29, %v747_v15  ;;  %v1394_v29 = vld [vmem:[#allocation5 + $0xb0] sm:$0xff] }
 0x430   :  { %902 = vmatpush.bf16.msrb.mxu1 %v1394_v29 }
 0x431   :  { %v737_v63 = vpop.permute.xlu0 %736 }
 0x434   :  { %v652_v17 = vpop.trf.xlu2  ;;  %903 = vmatpush.bf16.msrb.mxu1 %v1393_v14 }
 0x435   :  { %v748_v0 = vmul.f32 %v687_v10, %v652_v17  ;;  %v1391_v10 = vld [vmem:[#allocation5 + $0x98] sm:$0xff] }
 0x437   :  { %v763_v30 = vadd.f32 %v762_v16, %v748_v0  ;;  %v1392_v16 = vld [vmem:[#allocation5 + $0xa0] sm:$0xff] }
 0x438   :  { %904 = vmatpush.bf16.msrb.mxu1 %v1392_v16 }
 0x439   :  { %v784_v8 = vpop.permute.xlu0 %783 }
 0x43c   :  { %v653_v55 = vpop.trf.xlu2  ;;  %905 = vmatpush.bf16.msrb.mxu1 %v1391_v10 }
 0x43d   :  { %v749_v31 = vmul.f32 %v692_v39, %v653_v55  ;;  %v1390_v55 = vld [vmem:[#allocation5 + $0x90] sm:$0xff]  ;;  %v807_v39 = vld [vmem:[#allocation2] sm:$0xf] }
 0x43f   :  { %v764_v43 = vadd.f32 %v763_v30, %v749_v31 }
 0x440   :  { %906 = vmatpush.bf16.msrb.mxu1 %v1390_v55 }
 0x444   :  { %v654_v20 = vpop.trf.xlu2 }
 0x445   :  { %v750_v42 = vmul.f32 %v697_v45, %v654_v20  ;;  %v1389_v45 = vld [vmem:[#allocation5 + $0x88] sm:$0xff] }
 0x446   :  { %907 = vmatpush.bf16.msrb.mxu1 %v1389_v45 }
 0x447   :  { %v765_v50 = vadd.f32 %v764_v43, %v750_v42  ;;  %v1402_v42 = vld [vmem:[#allocation5 + $0xf0] sm:$0xff]  ;;  %v1401_v43 = vld [vmem:[#allocation5 + $0xe8] sm:$0xff] }
 0x44c   :  { %v655_v37 = vpop.trf.xlu2 }
 0x44d   :  { %v751_v44 = vmul.f32 %v702_v18, %v655_v37 }
 0x44f   :  { %v766_v23 = vadd.f32 %v765_v50, %v751_v44  ;;  %v1400_v44 = vld [vmem:[#allocation5 + $0xe0] sm:$0xff]  ;;  %v1398_v50 = vld [vmem:[#allocation5 + $0xd0] sm:$0xff] }
 0x454   :  { %v656_v38 = vpop.trf.xlu2 }
 0x455   :  { %v752_v53 = vmul.f32 %v707_v48, %v656_v38  ;;  %v808_v48 = vunpack.c.l.bf16 %v807_v39 }
 0x457   :  { %v767_v56 = vadd.f32 %v766_v23, %v752_v53  ;;  %v1397_v53 = vld [vmem:[#allocation5 + $0xc8] sm:$0xff] }
 0x45c   :  { %v657_v21 = vpop.trf.xlu2 }
 0x45d   :  { %v753_v54 = vmul.f32 %v712_v51, %v657_v21 }
 0x45f   :  { %v768_v24 = vadd.f32 %v767_v56, %v753_v54 }
 0x464   :  { %v658_v47 = vpop.trf.xlu2 }
 0x465   :  { %v754_v57 = vmul.f32 %v717_v40, %v658_v47  ;;  %v1388_v40 = vld [vmem:[#allocation5 + $0x80] sm:$0xff] }
 0x466   :  { %908 = vmatpush.bf16.msrb.mxu1 %v1388_v40 }
 0x467   :  { %v769_v61 = vadd.f32 %v768_v24, %v754_v57  ;;  %v1411_v57 = vld [vmem:[#allocation5 + $0x138] sm:$0xff]  ;;  %v1409_v24 = vld [vmem:[#allocation5 + $0x128] sm:$0xff] }
 0x468   :  { %1065 = vmatpush.bf16.msrb.mxu3 %v1411_v57 }
 0x46c   :  { %v659_v22 = vpop.trf.xlu2 }
 0x46d   :  { %v755_v60 = vmul.f32 %v722_v41, %v659_v22  ;;  %v1403_v41 = vld [vmem:[#allocation5 + $0xf8] sm:$0xff] }
 0x46e   :  { %983 = vmatpush.bf16.msrb.mxu2 %v1403_v41 }
 0x46f   :  { %v770_v25 = vadd.f32 %v769_v61, %v755_v60  ;;  %v1408_v60 = vld [vmem:[#allocation5 + $0x120] sm:$0xff]  ;;  %v1406_v61 = vld [vmem:[#allocation5 + $0x110] sm:$0xff] }
 0x472   :  { %984 = vmatpush.bf16.msrb.mxu2 %v1402_v42 }
 0x474   :  { %v660_v52 = vpop.trf.xlu2 }
 0x475   :  { %v756_v62 = vmul.f32 %v727_v58, %v660_v52  ;;  %v1396_v58 = vld [vmem:[#allocation5 + $0xc0] sm:$0xff] }
 0x476   :  { %985 = vmatpush.bf16.msrb.mxu2 %v1401_v43 }
 0x477   :  { %v771_v1 = vadd.f32 %v770_v25, %v756_v62  ;;  %v1424_v62 = vld [vmem:[#allocation7 + $0x2] ss:$0 sm:$0xff]  ;;  %v1405_v25 = vld [vmem:[#allocation5 + $0x108] sm:$0xff] }
 0x47a   :  { %986 = vmatpush.bf16.msrb.mxu2 %v1400_v44 }
 0x47c   :  { %v661_v46 = vpop.trf.xlu2 }
 0x47d   :  { %v757_v19 = vmul.f32 %v732_v59, %v661_v46  ;;  %v1399_v46 = vld [vmem:[#allocation5 + $0xd8] sm:$0xff]  ;;  %v1410_v59 = vld [vmem:[#allocation5 + $0x130] sm:$0xff] }
 0x47e   :  { %987 = vmatpush.bf16.msrb.mxu2 %v1399_v46  ;;  %1066 = vmatpush.bf16.msrb.mxu3 %v1410_v59 }
 0x47f   :  { %v772_v33 = vadd.f32 %v771_v1, %v757_v19  ;;  %v1404_v1 = vld [vmem:[#allocation5 + $0x100] sm:$0xff] }
 0x482   :  { %988 = vmatpush.bf16.msrb.mxu2 %v1398_v50  ;;  %1067 = vmatpush.bf16.msrb.mxu3 %v1409_v24 }
 0x484   :  { %v662_v32 = vpop.trf.xlu2 }
 0x485   :  { %v758_v2 = vmul.f32 %v737_v63, %v662_v32  ;;  %v1407_v32 = vld [vmem:[#allocation5 + $0x118] sm:$0xff] }
 0x486   :  { %989 = vmatpush.bf16.msrb.mxu2 %v1397_v53  ;;  %1068 = vmatpush.bf16.msrb.mxu3 %v1408_v60 }
 0x487   :  { %v773_v4 = vadd.f32 %v772_v33, %v758_v2 }
 0x48a   :  { %990 = vmatpush.bf16.msrb.mxu2 %v1396_v58  ;;  %1069 = vmatpush.bf16.msrb.mxu3 %v1407_v32 }
 0x48c   :  { %v663_v3 = vpop.trf.xlu2 }
 0x48d   :  { %v759_v34 = vmul.f32 %v742_v26, %v663_v3  ;;  %v1425_v3 = vld [vmem:[#allocation7 + $0x3] ss:$0 sm:$0xff] }
 0x48e   :  { %1070 = vmatpush.bf16.msrb.mxu3 %v1406_v61 }
 0x48f   :  { %v774_v5 = vadd.f32 %v773_v4, %v759_v34 }
 0x491   :  { %v775_v27 = vrot.slane %v774_v5, 4 }
 0x492   :  { %1071 = vmatpush.bf16.msrb.mxu3 %v1405_v25 }
 0x493   :  { %v776_v35 = vadd.f32 %v775_v27, %v774_v5 }
 0x495   :  { %v777_v36 = vrot.slane %v776_v35, 2 }
 0x496   :  { %1072 = vmatpush.bf16.msrb.mxu3 %v1404_v1 }
 0x497   :  { %v778_v49 = vadd.f32 %v777_v36, %v776_v35  ;;  %v1426_v36 = vld [vmem:[#allocation7 + $0x4] ss:$0 sm:$0xff] }
 0x499   :  { %v779_v6 = vrot.slane %v778_v49, 1 }
 0x49b   :  { %v780_v7 = vadd.f32 %v779_v6, %v778_v49 }
 0x49d   :  { %v786_v9 = vadd.f32 %v784_v8, %v780_v7 }
 0x49f   :  { %v788_v28 = vsub.f32 0.0, %v786_v9  ;;  %787 = vst [vmem:[#allocation9] sm:$0x1] %v786_v9 }
 0x4a0   :  { %1119 = dma.vmem_to_hbm [thread:$0]  %s1115_s23, 16, %s1117_s26, [#allocation10]  }
 0x4a1   :  { %v789_v11 = vmul.f32 1.442695, %v788_v28 }
 0x4a3   :  { %1427 = vpow2.f32 %v789_v11 }
 0x4a9   :  { %v1428_v13 = vpop.eup %1427 }
 0x4aa   :  { %v791_v15 = vadd.f32 1.0, %v1428_v13 }
 0x4ac   :  { %1429 = vrcp.f32 %v791_v15  ;;  %v803_v20 = vand.u32 2147483648, %v791_v15  ;;  %v801_v38 = vand.u32 2147483647, %v791_v15  ;;  %vm797_vm1 = vweird.f32 %v791_v15 }
 0x4ae   :  { %v804_v18 = vor.u32 1.1754944e-38, %v803_v20  ;;  %vm802_vm3 = vcmp.eq.f32.partialorder %v801_v38, 8.507059e+37 }
 0x4b2   :  { %v1430_v17 = vpop.eup %1429 }
 0x4b3   :  { %v793_v0 = vmul.f32 %v1430_v17, %v791_v15  ;;  %vm798_vm0 = vweird.f32 %v1430_v17 }
 0x4b4   :  { %vm799_vm2 = vmor %vm797_vm1, %vm798_vm0 }
 0x4b5   :  { %v794_v30 = vsub.f32 1.0, %v793_v0 }
 0x4b7   :  { %v795_v37 = vmul.f32 %v1430_v17, %v794_v30 }
 0x4b9   :  { %v796_v21 = vadd.f32 %v1430_v17, %v795_v37 }
 0x4bb   :  { %v800_v47 = vsel %vm799_vm2, %v1430_v17, %v796_v21 }
 0x4bc   :  { %v805_v22 = vsel %vm802_vm3, %v804_v18, %v800_v47 }
 0x4bd   :  { %v809_v51 = vperm.slane %v805_v22, 0 }
 0x4bf   :  { %v810_v52 = vmul.f32 %v809_v51, %v808_v48 }
 0x4c1   :  { %v811_v31 = vpack.c.bf16 %v810_v52, %v810_v52 }
 0x4c3   :  { %828 = vmatmul.bf16.vlgmr.msrb.gmra.mxu0 %v811_v31 }
 0x540   :  { %v829_v23 = vpop.f32.mrf.mxu0 }
 0x541   :  { %v851_v54 = vpack.c.bf16 %v829_v23, %v829_v23 }
 0x543   :  { %909 = vmatmul.bf16.vlgmr.msrb.gmra.mxu1 %v851_v54 }
 0x548   :  { %v831_v56 = vpop.f32.mrf.mxu0 }
 0x5c0   :  { %v910_v19 = vpop.f32.mrf.mxu1 }
 0x5c1   :  { %v911_v63 = vadd.f32 %v1424_v62, %v910_v19 }
 0x5c3   :  { %v914_v2 = vmax.f32 %v911_v63, 0.0 }
 0x5c5   :  { %v933_v33 = vpack.c.bf16 %v914_v2, %v914_v2 }
 0x5c7   :  { %991 = vmatmul.bf16.vlgmr.msrb.gmra.mxu2 %v933_v33 }
 0x5c8   :  { %v912_v26 = vpop.f32.mrf.mxu1 }
 0x64a   :  { %v992_v4 = vpop.f32.mrf.mxu2 }
 0x64b   :  { %v993_v34 = vadd.f32 %v1425_v3, %v992_v4 }
 0x64d   :  { %v996_v5 = vmax.f32 %v993_v34, 0.0 }
 0x64f   :  { %v1015_v27 = vpack.c.bf16 %v996_v5, %v996_v5 }
 0x651   :  { %1073 = vmatmul.bf16.vlgmr.msrb.gmra.mxu3 %v1015_v27 }
 0x652   :  { %v994_v35 = vpop.f32.mrf.mxu2 }
 0x6d4   :  { %v1074_v49 = vpop.f32.mrf.mxu3 }
 0x6d5   :  { %v1075_v6 = vadd.f32 %v1426_v36, %v1074_v49 }
 0x6d7   :  { %v1078_v7 = vsub.f32 0.0, %v1075_v6 }
 0x6d9   :  { %v1079_v8 = vmul.f32 1.442695, %v1078_v7 }
 0x6db   :  { %1431 = vpow2.f32 %v1079_v8 }
 0x6dc   :  { %v1076_v9 = vpop.f32.mrf.mxu3 }
 0x6e1   :  { %v1432_v28 = vpop.eup %1431 }
 0x6e2   :  { %v1081_v11 = vadd.f32 1.0, %v1432_v28 }
 0x6e4   :  { %1433 = vrcp.f32 %v1081_v11  ;;  %v1093_v14 = vand.u32 2147483648, %v1081_v11  ;;  %v1091_v16 = vand.u32 2147483647, %v1081_v11  ;;  %vm1087_vm5 = vweird.f32 %v1081_v11 }
 0x6e6   :  { %v1094_v17 = vor.u32 1.1754944e-38, %v1093_v14  ;;  %vm1092_vm7 = vcmp.eq.f32.partialorder %v1091_v16, 8.507059e+37 }
 0x6ea   :  { %v1434_v12 = vpop.eup %1433 }
 0x6eb   :  { %v1083_v29 = vmul.f32 %v1434_v12, %v1081_v11  ;;  %vm1088_vm4 = vweird.f32 %v1434_v12 }
 0x6ec   :  { %vm1089_vm6 = vmor %vm1087_vm5, %vm1088_vm4 }
 0x6ed   :  { %v1084_v13 = vsub.f32 1.0, %v1083_v29 }
 0x6ef   :  { %v1085_v15 = vmul.f32 %v1434_v12, %v1084_v13 }
 0x6f1   :  { %v1086_v10 = vadd.f32 %v1434_v12, %v1085_v15 }
 0x6f3   :  { %v1090_v0 = vsel %vm1089_vm6, %v1434_v12, %v1086_v10 }
 0x6f4   :  { %v1095_v30 = vsel %vm1092_vm7, %v1094_v17, %v1090_v0 }
 0x6f5   :  { %1097 = vst [vmem:[#allocation8] sm:$0xff] %v1095_v30 }
 0x6f6   :  { %1108 = dma.vmem_to_hbm [thread:$0]  %s1104_s27, 128, %s1106_s30, [#allocation4]  }
 0x6f7   :  { %1559 = dma.done.wait [#allocation4], 128  }
 0x6f8   :  { %1560 = vsyncadd [#allocation4], 4294967168 }
 0x6f9   :  { %1561 = dma.done.wait [#allocation10], 16  }
 0x6fa   :  { %1562 = vsyncadd [#allocation10], 4294967280 }
 0x6fb   :  { %1128 = vsyncpa [#allocation3], 1 }
 0x6fc   :  { %1129 = vsyncpa [#allocation6], 1 }
 0x6fd   :  { %1130 = vsyncpa [#allocation4], 1 }
 0x6fe   :  { %1131 = vsyncpa [#allocation10], 1 }

</bundles_post_ra>
